<compile_context>
chip_gen: v6e
topology: v6e:2x2x1
jax: 0.10.0
libtpu: 0.0.40
codegen_flags: <defaults>
</compile_context>

<pallas_src>
import numpy as np
import jax
import jax.numpy as jnp
from jax.experimental import pallas as pl
from jax.experimental.pallas import tpu as pltpu


def _cbl_upsample2x_kernel(x_ref, w_ref, scale_ref, shift_ref, dup_ref, o_ref):
    """conv1x1 + BN + LeakyReLU + 2x nearest upsample for TH rows of one image.

    x_ref:     (Cin, TH*W)      NCHW rows (metadata-only view of the input)
    w_ref:     (Cout, Cin)      1x1 conv weight, model dtype
    scale_ref: (Cout, 1)  f32   gamma / sqrt(var + eps)
    shift_ref: (Cout, 1)  f32   beta - mean * scale
    dup_ref:   (TH*W, 4*TH*W)   0/1 nearest-upsample duplication matrix
    o_ref:     (Cout, 4*TH*W)   NCHW output rows 2*h0 .. 2*(h0+TH)-1, flattened
    """
    # 1x1 conv == channel-major matmul with f32 accumulation on the MXU.
    y = jnp.dot(w_ref[...], x_ref[...], preferred_element_type=jnp.float32)
    y = y * scale_ref[...] + shift_ref[...]          # eval-mode BatchNorm (f32)
    y = jnp.where(y > 0, y, 0.1 * y)                 # LeakyReLU(0.1)
    y = y.astype(o_ref.dtype)                        # downcast BEFORE 4x replication

    # 2x nearest upsample: out[c, 4hW + 2aW + 2w + b] = y[c, hW + w], a,b in {0,1}.
    # A matmul with a constant 0/1 matrix lets the (otherwise idle) MXU do the
    # lane interleave so the store is a single contiguous lane-dense slab.
    up = jnp.dot(y, dup_ref[...], preferred_element_type=jnp.float32)
    o_ref[...] = up.astype(o_ref.dtype)


def _nearest2x_dup_matrix(th, W, dtype):
    """P[h*W + w, 4*h*W + 2*a*W + 2*w + b] = 1 for a, b in {0,1}.

    Right-multiplying a channel-major (Cout, th*W) tile by P yields the
    2x-nearest-upsampled tile already in flat NCHW order.
    """
    q = np.arange(4 * th * W)
    src = (q // (4 * W)) * W + (q % (2 * W)) // 2      # source column for q
    p = np.arange(th * W)
    dup = (p[:, None] == src[None, :]).astype(np.float32)
    return jnp.asarray(dup, dtype=dtype)


def _vmem_capacity_bytes():
    # Generation-aware tiling: v5e/v6e have 128 MiB of VMEM, v7x only 64 MiB.
    try:
        return int(pltpu.get_tpu_info().vmem_capacity_bytes)
    except Exception:
        return 64 * 1024 * 1024        # conservative (v7x-sized) fallback


def _pick_row_block(H, W, Cin, Cout, itemsize, n_images, vmem_cap):
    """Largest row block TH (divisor of H) whose working set fits the budget."""
    budget = max(vmem_cap // 12, 2 * 1024 * 1024)  # ~10.5 MiB @128 MiB, ~5.3 MiB @64 MiB

    def step_bytes(th):
        s = th * W
        x_blk = 2 * Cin * s * itemsize             # double-buffered input slab
        o_blk = 2 * Cout * 4 * s * itemsize        # double-buffered output slab
        dup = 4 * s * s * itemsize                 # resident duplication matrix
        f32 = Cout * s * 4 + Cout * 4 * s * 4      # conv + upsample f32 accumulators
        return x_blk + o_blk + dup + f32

    # Legal blocks: th divides H and (th == H or th*W multiple of 128), so every
    # BlockSpec trailing dim obeys the (..., 128) / full-extent rule.
    cands = [t for t in range(H, 0, -1)
             if H % t == 0 and (t == H or (t * W) % 128 == 0)]
    th = cands[-1]                                 # smallest legal fallback
    for t in cands:                                # largest first
        if step_bytes(t) <= budget:
            th = t
            break

    # On 64 MiB (v7x-class, 2-TensorCore) parts make sure the grid has >= 2
    # steps when there is only one image so both cores get work.  On 1-TC chips
    # (v5e/v6e) an extra step is ~0.35us of pure overhead, so skip it there.
    if (n_images == 1 and th == H and len(cands) > 1
            and vmem_cap <= 64 * 1024 * 1024):
        th = cands[1]
    # TODO(synk): with odd H (13x13 YOLO maps) and a single image there is no
    # legal row split, so v7x runs on one TensorCore for that case.
    return th


def upsample_forward(x_nchw, conv_weight, gamma, beta, running_mean, running_var,
                     eps=1e-5):
    """Forward pass of Upsample (kernel_size=1) as a single Pallas TPU kernel.

    x_nchw:      (N, Cin, H, W)
    conv_weight: (Cout, Cin, 1, 1)   -- PyTorch Conv2d weight layout (no bias)
    returns:     (N, Cout, 2H, 2W)   -- NCHW, matching the PyTorch module
    """
    N, Cin, H, W = x_nchw.shape
    Cout = conv_weight.shape[0]
    in_dtype = x_nchw.dtype
    itemsize = jnp.dtype(in_dtype).itemsize

    # Eval-mode BN kept as a separate f32 scale/shift applied to the f32 conv
    # accumulator inside the kernel (closer to PyTorch's conv-then-BN than
    # folding the scale into a low-precision weight).
    scale_1d = (gamma / jnp.sqrt(running_var + eps)).astype(jnp.float32)
    shift_1d = beta.astype(jnp.float32) - running_mean.astype(jnp.float32) * scale_1d
    scale = scale_1d.reshape(Cout, 1)
    shift = shift_1d.reshape(Cout, 1)
    w_cm = conv_weight.reshape(Cout, Cin).astype(in_dtype)           # (Cout, Cin)

    # Metadata-only view of the NCHW input: no XLA transpose anywhere.
    x_rows = x_nchw.reshape(N, Cin, H * W)

    vmem_cap = _vmem_capacity_bytes()
    vmem_limit = max(min(vmem_cap * 3 // 4, 96 * 1024 * 1024), 32 * 1024 * 1024)
    th = _pick_row_block(H, W, Cin, Cout, itemsize, N, vmem_cap)
    hb = H // th

    dup = _nearest2x_dup_matrix(th, W, in_dtype)

    out_flat = pl.pallas_call(
        _cbl_upsample2x_kernel,
        out_shape=jax.ShapeDtypeStruct((N, Cout, 4 * H * W), in_dtype),
        grid_spec=pltpu.PrefetchScalarGridSpec(
            num_scalar_prefetch=0,
            grid=(N, hb),
            in_specs=[
                # TH rows of one NCHW image, squeezed to (Cin, TH*W)
                pl.BlockSpec((None, Cin, th * W), lambda n, h: (n, 0, h)),
                # conv weight / BN scale / BN shift: resident (constant index)
                pl.BlockSpec((Cout, Cin), lambda n, h: (0, 0)),
                pl.BlockSpec((Cout, 1), lambda n, h: (0, 0)),
                pl.BlockSpec((Cout, 1), lambda n, h: (0, 0)),
                # nearest-upsample duplication matrix: resident
                pl.BlockSpec((th * W, 4 * th * W), lambda n, h: (0, 0)),
            ],
            # Flat NCHW output: rows 2*h*TH .. 2*(h+1)*TH - 1 of image n.
            out_specs=pl.BlockSpec((None, Cout, 4 * th * W),
                                   lambda n, h: (n, 0, h)),
        ),
        compiler_params=pltpu.CompilerParams(
            dimension_semantics=("parallel", "parallel"),
            vmem_limit_bytes=vmem_limit),
    )(x_rows, w_cm, scale, shift, dup)

    # (N, Cout, 2H*2W) -> (N, Cout, 2H, 2W): metadata-only reshape, already NCHW.
    return out_flat.reshape(N, Cout, 2 * H, 2 * W)


def _reference_forward(x_nchw, conv_weight, gamma, beta, mean, var, eps=1e-5):
    """Pure-JAX reference for verification."""
    N, Cin, H, W = x_nchw.shape
    Cout = conv_weight.shape[0]
    w2 = conv_weight.reshape(Cout, Cin)
    y = jnp.einsum("nchw,dc->ndhw", x_nchw, w2)                       # 1x1 conv
    scale = (gamma / jnp.sqrt(var + eps)).reshape(1, Cout, 1, 1)
    shift = (beta - mean * gamma / jnp.sqrt(var + eps)).reshape(1, Cout, 1, 1)
    y = y * scale + shift
    y = jnp.where(y > 0, y, 0.1 * y)                                  # LeakyReLU
    y = jnp.repeat(jnp.repeat(y, 2, axis=2), 2, axis=3)               # nearest 2x
    return y


if __name__ == "__main__":
    key = jax.random.PRNGKey(0)
    k_x, k_w, k_g, k_b, k_m, k_v = jax.random.split(key, 6)

    N, Cin, Cout, H, W = 2, 4, 8, 16, 16  # small shapes consistent with the module

    x = jax.random.normal(k_x, (N, Cin, H, W), dtype=jnp.float32)
    conv_weight = jax.random.normal(k_w, (Cout, Cin, 1, 1), dtype=jnp.float32) * 0.1
    gamma = jax.random.normal(k_g, (Cout,), dtype=jnp.float32) * 0.1 + 1.0
    beta = jax.random.normal(k_b, (Cout,), dtype=jnp.float32) * 0.1
    running_mean = jax.random.normal(k_m, (Cout,), dtype=jnp.float32) * 0.1
    running_var = jax.random.uniform(k_v, (Cout,), dtype=jnp.float32,
                                     minval=0.5, maxval=1.5)

    out = upsample_forward(x, conv_weight, gamma, beta, running_mean, running_var)
    out = jax.block_until_ready(out)

    ref = _reference_forward(x, conv_weight, gamma, beta, running_mean, running_var)
    assert out.shape == (N, Cout, 2 * H, 2 * W), out.shape
    assert jnp.allclose(out, ref, atol=1e-4, rtol=1e-4), "mismatch vs reference"

    print("KERNEL_OK")
</pallas_src>

<mosaic_0001>
module attributes {stable_mosaic.version = 11 : i64} {
  func.func @_cbl_upsample2x_kernel(%arg0: i32, %arg1: i32, %arg2: memref<1x4x256xf32, #tpu.memory_space<vmem>>, %arg3: memref<8x4xf32, #tpu.memory_space<vmem>>, %arg4: memref<8x1xf32, #tpu.memory_space<vmem>>, %arg5: memref<8x1xf32, #tpu.memory_space<vmem>>, %arg6: memref<256x1024xf32, #tpu.memory_space<vmem>>, %arg7: memref<1x8x1024xf32, #tpu.memory_space<vmem>>) attributes {dimension_semantics = [#tpu.dimension_semantics<parallel>, #tpu.dimension_semantics<parallel>], iteration_bounds = array<i64: 2, 1>, scalar_prefetch = 0 : i64, scratch_operands = 0 : i64, tpu.core_type = #tpu.core_type<tc>, window_params = [{transform_indices = @transform_0, window_bounds = array<i64: 1, 4, 256>}, {pipeline_mode = #tpu.pipeline_mode<synchronous>, transform_indices = @transform_1, window_bounds = array<i64: 8, 4>}, {pipeline_mode = #tpu.pipeline_mode<synchronous>, transform_indices = @transform_2, window_bounds = array<i64: 8, 1>}, {pipeline_mode = #tpu.pipeline_mode<synchronous>, transform_indices = @transform_3, window_bounds = array<i64: 8, 1>}, {pipeline_mode = #tpu.pipeline_mode<synchronous>, transform_indices = @transform_4, window_bounds = array<i64: 256, 1024>}, {transform_indices = @transform_5, window_bounds = array<i64: 1, 8, 1024>}]} {
    %c0 = arith.constant 0 : index
    %c0_0 = arith.constant 0 : index
    %0 = vector.load %arg3[%c0, %c0_0] : memref<8x4xf32, #tpu.memory_space<vmem>>, vector<8x4xf32>
    %c0_1 = arith.constant 0 : index
    %c0_2 = arith.constant 0 : index
    %c0_3 = arith.constant 0 : index
    %1 = vector.load %arg2[%c0_1, %c0_2, %c0_3] : memref<1x4x256xf32, #tpu.memory_space<vmem>>, vector<1x4x256xf32>
    %2 = vector.shape_cast %1 : vector<1x4x256xf32> to vector<4x256xf32>
    %cst = arith.constant dense<0.000000e+00> : vector<8x256xf32>
    %3 = tpu.matmul %0, %2, %cst {dimension_numbers = #tpu.dot_dimension_numbers<[1], [0], [0], [1], [0, 0, 1, 1], [], []>} : vector<8x4xf32>, vector<4x256xf32>, vector<8x256xf32> -> vector<8x256xf32>
    %c0_4 = arith.constant 0 : index
    %c0_5 = arith.constant 0 : index
    %4 = vector.load %arg4[%c0_4, %c0_5] : memref<8x1xf32, #tpu.memory_space<vmem>>, vector<8x1xf32>
    %5 = vector.broadcast %4 : vector<8x1xf32> to vector<8x256xf32>
    %6 = arith.mulf %3, %5 : vector<8x256xf32>
    %c0_6 = arith.constant 0 : index
    %c0_7 = arith.constant 0 : index
    %7 = vector.load %arg5[%c0_6, %c0_7] : memref<8x1xf32, #tpu.memory_space<vmem>>, vector<8x1xf32>
    %8 = vector.broadcast %7 : vector<8x1xf32> to vector<8x256xf32>
    %9 = arith.addf %6, %8 : vector<8x256xf32>
    %cst_8 = arith.constant 0.000000e+00 : f32
    %10 = vector.broadcast %cst_8 : f32 to vector<8x256xf32>
    %11 = arith.cmpf ogt, %9, %10 : vector<8x256xf32>
    %cst_9 = arith.constant 1.000000e-01 : f32
    %12 = vector.broadcast %cst_9 : f32 to vector<8x256xf32>
    %13 = arith.mulf %12, %9 : vector<8x256xf32>
    %14 = arith.select %11, %9, %13 : vector<8x256xi1>, vector<8x256xf32>
    %c0_10 = arith.constant 0 : index
    %c0_11 = arith.constant 0 : index
    %15 = vector.load %arg6[%c0_10, %c0_11] : memref<256x1024xf32, #tpu.memory_space<vmem>>, vector<256x1024xf32>
    %cst_12 = arith.constant dense<0.000000e+00> : vector<8x1024xf32>
    %16 = tpu.matmul %14, %15, %cst_12 {dimension_numbers = #tpu.dot_dimension_numbers<[1], [0], [0], [1], [0, 0, 1, 1], [], []>} : vector<8x256xf32>, vector<256x1024xf32>, vector<8x1024xf32> -> vector<8x1024xf32>
    %c0_13 = arith.constant 0 : index
    %c0_14 = arith.constant 0 : index
    %c0_15 = arith.constant 0 : index
    %17 = vector.load %arg7[%c0_13, %c0_14, %c0_15] : memref<1x8x1024xf32, #tpu.memory_space<vmem>>, vector<1x8x1024xf32>
    %18 = vector.shape_cast %17 : vector<1x8x1024xf32> to vector<8x1024xf32>
    %19 = vector.shape_cast %16 : vector<8x1024xf32> to vector<1x8x1024xf32>
    tpu.vector_store %arg7[%c0_13, %c0_14, %c0_15], %19 {strides = array<i32>} : memref<1x8x1024xf32, #tpu.memory_space<vmem>>, vector<1x8x1024xf32>,
    return
  }
  func.func @transform_0(%arg0: i32, %arg1: i32) -> (i32, i32, i32) {
    %c0_i32 = arith.constant 0 : i32
    %c0_i32_0 = arith.constant 0 : i32
    return %arg0, %c0_i32, %arg1 : i32, i32, i32
  }
  func.func @transform_1(%arg0: i32, %arg1: i32) -> (i32, i32) {
    %c0_i32 = arith.constant 0 : i32
    %c0_i32_0 = arith.constant 0 : i32
    %c0_i32_1 = arith.constant 0 : i32
    return %c0_i32, %c0_i32_0 : i32, i32
  }
  func.func @transform_2(%arg0: i32, %arg1: i32) -> (i32, i32) {
    %c0_i32 = arith.constant 0 : i32
    %c0_i32_0 = arith.constant 0 : i32
    %c0_i32_1 = arith.constant 0 : i32
    return %c0_i32, %c0_i32_0 : i32, i32
  }
  func.func @transform_3(%arg0: i32, %arg1: i32) -> (i32, i32) {
    %c0_i32 = arith.constant 0 : i32
    %c0_i32_0 = arith.constant 0 : i32
    %c0_i32_1 = arith.constant 0 : i32
    return %c0_i32, %c0_i32_0 : i32, i32
  }
  func.func @transform_4(%arg0: i32, %arg1: i32) -> (i32, i32) {
    %c0_i32 = arith.constant 0 : i32
    %c0_i32_0 = arith.constant 0 : i32
    %c0_i32_1 = arith.constant 0 : i32
    return %c0_i32, %c0_i32_0 : i32, i32
  }
  func.func @transform_5(%arg0: i32, %arg1: i32) -> (i32, i32, i32) {
    %c0_i32 = arith.constant 0 : i32
    %c0_i32_0 = arith.constant 0 : i32
    return %arg0, %c0_i32, %arg1 : i32, i32, i32
  }
}

</mosaic_0001>

<bundles_post_ra>
// kernel: tpu_custom_call.1
= control target key start
LH: loop header
LB: loop body
LE: loop exit
PB: predicated region body
PF: predicated region fallthrough
CT: control target
= control target key end

     0   :  { %10 = vsyncpa [#allocation3], 0  ;;  %s1411_s0 = inlined_call_operand.vmem [shape: f32[2,4,256], index: 0, kind: input, shape index: {}]   ;;  %s1412_s1 = inlined_call_operand.vmem [shape: f32[8,4], index: 1, kind: input, shape index: {}]   ;;  %s1413_s2 = inlined_call_operand.vmem [shape: f32[8,1], index: 2, kind: input, shape index: {}]   ;;  %s1414_s3 = inlined_call_operand.vmem [shape: f32[8,1], index: 3, kind: input, shape index: {}]   ;;  %s1415_s4 = inlined_call_operand.hbm [shape: f32[256,1024], index: 4, kind: input, shape index: {}]   ;;  %s1416_s5 = inlined_call_operand.hbm [shape: f32[2,8,1024], index: 5, kind: output, shape index: {}]  }
   0x1   :  { %11 = vsyncpa [#allocation4], 0 }
   0x2   :  { %13 = vsyncpa [#allocation4 + $0x1], 0  ;;  %s1264_s18 = smov 0   ;;  %s1266_s19 = smov 0  }
   0x3   :  { %s1268_s20 = smov 0   ;;  %s1270_s21 = smov 0  }
   0x4   :  { %s1272_s22 = smov 0   ;;  %s1274_s23 = smov 0  }
   0x5 LB: > { %s1028_s24 = sadd.s32 4294967295, %s1226_s23   ;;  %s1029_s25 = sadd.s32 4294967294, %s1226_s23   ;;  %s1226_s23 = sphi %s1274_s23, %s19_s23   ;;  %s1222_s22 = sphi %s1272_s22, %s1425_s22   ;;  %s1218_s21 = sphi %s1270_s21, %s1424_s21   ;;  %s1214_s20 = sphi %s1268_s20, %s1423_s20   ;;  %s1210_s19 = sphi %s1266_s19, %s1422_s19   ;;  %s1206_s18 = sphi %s1264_s18, %s1421_s18  }
   0x6   : > { %s31_s26 = sadd.s32 1, %s1222_s22  ;;  %s152_s27 = sadd.s32 1, %s1214_s20 }
   0x7   : > { %p33_p0 = scmp.ge.s32.totalorder %s31_s26, 2  ;;  %p162_p1 = scmp.ne.s32.totalorder %s1214_s20, %s1210_s19 }
   0x8   : > { %p163_p2 = scmp.eq.s32.totalorder %s1028_s24, 1  ;;  %p168_p3 = scmp.ne.s32.totalorder %s1210_s19, %s1206_s18 }
   0x9   : > { %s1427_s26 = smov (%p33_p0, %s31_s26), 0  ;;  %p169_p5 = scmp.eq.s32.totalorder %s1029_s25, 1 }
   0xa   : > { %p1304_p4 = por %p163_p2, %p162_p1  ;;  %s147_s29 = ssub.s32 %s1222_s22, %s1427_s26 }
   0xb   : > { %p1030_p6 = scmp.ge.s32.totalorder %s1226_s23, 1  ;;  %p150_p7 = scmp.eq.s32.totalorder %s147_s29, 0 }
   0xc   : > { %p1311_p8 = por %p169_p5, %p168_p3  ;;  %p176_p9 = scmp.lt.s32.totalorder %s1226_s23, 3 }
   0xd   : > { %s1317_s6 = scalar_select %p150_p7, %s1214_s20, %s152_s27  }
   0xe   : > { %p1319_p10 = pnand %p1030_p6, %p176_p9  ;;  %p1323_p11 = scmp.eq.s32.totalorder %s1028_s24, 0 }
   0xf   : > { %s1228_s9 = smov [#allocation2]  }
  0x10   : > { %p1054_p12 = pneg %p1319_p10  ;;  %s197_s10 = sshll.u32 %s1228_s9, 4  ;;  %s198_s10 = int_to_ptr.vmem [resolvable:$true] %s197_s10 }
  0x11   : > { %s1131_s11 = scalar_lea.vmem %s198_s10, 32768  ;;  %p1139_p5 = scmp.lt.s32.totalorder %s198_s10, %s198_s10 }
  0x12   : > { %p1055_p13 = pnand %p1323_p11, %p1054_p12  ;;  %p1132_p1 = scmp.ne.s32.totalorder %s198_s10, %s1131_s11 }
  0x13   : > { %p1140_p6 = scmp.lt.s32.totalorder %s1131_s11, %s1131_s11 }
  0x14   : > { %p1122_p0 = pneg %p1055_p13 }
  0x15   : > { %p1141_p7 = por %p1140_p6, %p1139_p5 }
  0x16   : > { %p1134_p2 = pnand %p1132_p1, %p1122_p0 }
  0x18   : > { %p1135_p3 = pneg %p1134_p2 }
  0x1a   : > { %p1142_p9 = pnand %p1141_p7, %p1135_p3 }
  0x1c   : > { %1145 = shalt.err (!%p1142_p9)
}
  0x1d   : > { %s1229_s12 = smov 1024   ;;  %s1230_s13 = smov 64  }
  0x1e   : > { %1057 = dma.hbm_to_vmem [thread:$0]  (!%p1055_p13), %s1415_s4, 32768, %s198_s10, [#allocation3], %s1229_s12, %s1229_s12, %s1230_s13  }
  0x1f   : > { %226 = sbr.rel (%p1319_p10) target bundleno = 524 (0x20c), region = 40 }
  0x24   : > { %1197 = dma.done.wait (%p1323_p11), [#allocation3], 32768  }
  0x25   : > { %1199 = vsyncadd (%p1323_p11), [#allocation3], 4294934528  ;;  %p259_p12 = scmp.lt.s32.totalorder %s1218_s21, 1  ;;  %v1231_v0 = vmov 0.0   ;;  %v1232_v1 = vmov 0   ;;  %vm277_vm0 = vcmask 1043456  }
  0x26   : > { %346 = vmatprep.mubr.f32.mxu0 %v1231_v0  ;;  %1118 = vset.pattern.permute.xlu0 %v1232_v1  ;;  %v353_v3 = vld [vmem:[%s1413_s2] sm:$0xff]  ;;  %v496_v6 = vld [vmem:[#allocation2 + $0x3c8] sm:$0xff]  ;;  %vm273_vm1 = vcmask 31744   ;;  %v498_v10 = vld [vmem:[#allocation2 + $0x3d8] sm:$0xff]  ;;  %s255_s12 = sand.u32 1, %s1210_s19   ;;  %s1047_s15 = sshll.u32 %s1218_s21, 10 }
  0x27   : > { %s260_s16 = scalar_select %p259_p12, %s1218_s21, 1  ;;  %v269_v5 = vld [vmem:[%s1412_s1] sm:$0xff]  ;;  %356 = vperm.xlu0 %1118, %v353_v3   ;;  %631 = vmatprep.subr.mxu1 %v496_v6  ;;  %v488_v9 = vld [vmem:[#allocation2 + $0x388] sm:$0xff]  ;;  %v497_v12 = vld [vmem:[#allocation2 + $0x3d0] sm:$0xff] }
  0x28   : > { %v361_v7 = vld [vmem:[%s1414_s3] sm:$0xff]  ;;  %v480_v13 = vld [vmem:[#allocation2 + $0x348] sm:$0xff]  ;;  %v490_v14 = vld [vmem:[#allocation2 + $0x398] sm:$0xff]  ;;  %s1035_s13 = sshll.u32 %s255_s12, 6  ;;  %s1365_s25 = scalar_lea.hbm %s1416_s5, %s1047_s15 }
  0x29   : > { %s1046_s17 = sshll.u32 %s260_s16, 3  ;;  %v495_v8 = vld [vmem:[#allocation2 + $0x3c0] sm:$0xff]  ;;  %v489_v16 = vld [vmem:[#allocation2 + $0x390] sm:$0xff]  ;;  %v472_v17 = vld [vmem:[#allocation2 + $0x308] sm:$0xff]  ;;  %s257_s14 = scalar_lea.vmem [#allocation5], %s1035_s13 }
  0x2a   : > { %s266_s27 = scalar_lea.vmem %s1411_s0, %s1046_s17  ;;  %632 = vmatpush1.msra.mxu1 %v495_v8  ;;  %v487_v11 = vld [vmem:[#allocation2 + $0x380] sm:$0xff]  ;;  %v482_v18 = vld [vmem:[#allocation2 + $0x358] sm:$0xff]  ;;  %v481_v20 = vld [vmem:[#allocation2 + $0x350] sm:$0xff]  ;;  %s940_s16 = sshll.u32 %s257_s14, 4  ;;  %s1367_s16 = int_to_ptr.vmem [resolvable:$true] %s940_s16 }
  0x2b   : > { %v270_v2 = vld [vmem:[%s266_s27] sm:$0xff]  ;;  %633 = vmatprep.subr.mxu1 %v488_v9  ;;  %364 = vperm.xlu0 %1118, %v361_v7   ;;  %v464_v21 = vld [vmem:[#allocation2 + $0x2c8] sm:$0xff]  ;;  %v474_v22 = vld [vmem:[#allocation2 + $0x318] sm:$0xff]  ;;  %s924_s21 = scalar_lea.sflag [#allocation4], %s255_s12  ;;  %s1146_s27 = scalar_lea.vmem %s1367_s16, 1024 }
  0x2c   : > { %v272_v4 = vcombine.high %v270_v2, %v270_v2  ;;  %v479_v15 = vld [vmem:[#allocation2 + $0x340] sm:$0xff]  ;;  %634 = vmatpush1.msra.mxu1 %v487_v11  ;;  %v473_v24 = vld [vmem:[#allocation2 + $0x310] sm:$0xff]  ;;  %v456_v25 = vld [vmem:[#allocation2 + $0x288] sm:$0xff]  ;;  %p1147_p10 = scmp.ne.s32.totalorder %s1367_s16, %s1146_s27  ;;  %s1233_s29 = smov [#allocation5]  }
  0x2d   : > { %635 = vmatprep.subr.mxu1 %v480_v13  ;;  %v471_v19 = vld [vmem:[#allocation2 + $0x300] sm:$0xff]  ;;  %v466_v26 = vld [vmem:[#allocation2 + $0x2d8] sm:$0xff]  ;;  %v465_v28 = vld [vmem:[#allocation2 + $0x2d0] sm:$0xff]  ;;  %s1150_s7 = sshll.u32 %s1233_s29, 4  ;;  %s1151_s7 = int_to_ptr.vmem [resolvable:$false] %s1150_s7 }
  0x2e   : > { %1038 = vmatprep.subr.msk.mxu0 %vm277_vm0, %v272_v4  ;;  %636 = vmatpush1.msra.mxu1 %v479_v15  ;;  %v463_v23 = vld [vmem:[#allocation2 + $0x2c0] sm:$0xff]  ;;  %v448_v29 = vld [vmem:[#allocation2 + $0x248] sm:$0xff]  ;;  %v458_v30 = vld [vmem:[#allocation2 + $0x298] sm:$0xff]  ;;  %p1148_p11 = pnand %p1147_p10, %p1304_p4  ;;  %s1152_s8 = scalar_lea.vmem %s1151_s7, 2048 }
  0x2f   : > { %1039 = vmatpush1.msk.msra.mxu0 %vm277_vm0, %v270_v2  ;;  %637 = vmatprep.subr.mxu1 %v472_v17  ;;  %v455_v27 = vld [vmem:[#allocation2 + $0x280] sm:$0xff]  ;;  %v457_v32 = vld [vmem:[#allocation2 + $0x290] sm:$0xff]  ;;  %v440_v33 = vld [vmem:[#allocation2 + $0x208] sm:$0xff]  ;;  %p1153_p0 = scmp.lt.s32.totalorder %s1367_s16, %s1151_s7  ;;  %p1154_p1 = scmp.lt.s32.totalorder %s1152_s8, %s1146_s27 }
  0x30   : > { %1040 = vmatmul.mubr.msk.f32.vlgmr.msra.gmra.mxu0 %vm273_vm1, %v269_v5  ;;  %702 = vmatprep.subr.mxu0 %v498_v10  ;;  %v447_v31 = vld [vmem:[#allocation2 + $0x240] sm:$0xff]  ;;  %v450_v34 = vld [vmem:[#allocation2 + $0x258] sm:$0xff]  ;;  %v449_v36 = vld [vmem:[#allocation2 + $0x250] sm:$0xff]  ;;  %p1149_p13 = pneg %p1148_p11 }
  0x31   : > { %703 = vmatpush1.msra.mxu0 %v497_v12  ;;  %638 = vmatpush1.msra.mxu1 %v471_v19  ;;  %v439_v35 = vld [vmem:[#allocation2 + $0x200] sm:$0xff]  ;;  %v432_v37 = vld [vmem:[#allocation2 + $0x1c8] sm:$0xff]  ;;  %v442_v38 = vld [vmem:[#allocation2 + $0x218] sm:$0xff]  ;;  %p1155_p2 = por %p1154_p1, %p1153_p0 }
  0x32   : > { %704 = vmatprep.subr.mxu0 %v490_v14  ;;  %639 = vmatprep.subr.mxu1 %v464_v21  ;;  %v431_v39 = vld [vmem:[#allocation2 + $0x1c0] sm:$0xff]  ;;  %v441_v40 = vld [vmem:[#allocation2 + $0x210] sm:$0xff]  ;;  %v424_v41 = vld [vmem:[#allocation2 + $0x188] sm:$0xff] }
  0x33   : > { %705 = vmatpush1.msra.mxu0 %v489_v16  ;;  %640 = vmatpush1.msra.mxu1 %v463_v23  ;;  %v434_v42 = vld [vmem:[#allocation2 + $0x1d8] sm:$0xff]  ;;  %v423_v43 = vld [vmem:[#allocation2 + $0x180] sm:$0xff]  ;;  %v433_v44 = vld [vmem:[#allocation2 + $0x1d0] sm:$0xff]  ;;  %p1156_p3 = pnand %p1155_p2, %p1149_p13 }
  0x34   : > { %706 = vmatprep.subr.mxu0 %v482_v18  ;;  %641 = vmatprep.subr.mxu1 %v456_v25  ;;  %v416_v45 = vld [vmem:[#allocation2 + $0x148] sm:$0xff]  ;;  %v426_v46 = vld [vmem:[#allocation2 + $0x198] sm:$0xff]  ;;  %v415_v47 = vld [vmem:[#allocation2 + $0x140] sm:$0xff] }
  0x35   : > { %707 = vmatpush1.msra.mxu0 %v481_v20  ;;  %642 = vmatpush1.msra.mxu1 %v455_v27  ;;  %v425_v48 = vld [vmem:[#allocation2 + $0x190] sm:$0xff]  ;;  %v408_v49 = vld [vmem:[#allocation2 + $0x108] sm:$0xff]  ;;  %v418_v50 = vld [vmem:[#allocation2 + $0x158] sm:$0xff] }
  0x36   : > { %708 = vmatprep.subr.mxu0 %v474_v22  ;;  %643 = vmatprep.subr.mxu1 %v448_v29  ;;  %v407_v51 = vld [vmem:[#allocation2 + $0x100] sm:$0xff]  ;;  %v417_v52 = vld [vmem:[#allocation2 + $0x150] sm:$0xff]  ;;  %v400_v53 = vld [vmem:[#allocation2 + $0xc8] sm:$0xff] }
  0x37   : > { %709 = vmatpush1.msra.mxu0 %v473_v24  ;;  %644 = vmatpush1.msra.mxu1 %v447_v31  ;;  %v410_v54 = vld [vmem:[#allocation2 + $0x118] sm:$0xff]  ;;  %v399_v55 = vld [vmem:[#allocation2 + $0xc0] sm:$0xff]  ;;  %v409_v56 = vld [vmem:[#allocation2 + $0x110] sm:$0xff] }
  0x38   : > { %710 = vmatprep.subr.mxu0 %v466_v26  ;;  %645 = vmatprep.subr.mxu1 %v440_v33  ;;  %v392_v57 = vld [vmem:[#allocation2 + $0x88] sm:$0xff]  ;;  %v402_v58 = vld [vmem:[#allocation2 + $0xd8] sm:$0xff]  ;;  %v391_v59 = vld [vmem:[#allocation2 + $0x80] sm:$0xff] }
  0x39   : > { %711 = vmatpush1.msra.mxu0 %v465_v28  ;;  %646 = vmatpush1.msra.mxu1 %v439_v35  ;;  %v401_v60 = vld [vmem:[#allocation2 + $0xd0] sm:$0xff]  ;;  %v384_v61 = vld [vmem:[#allocation2 + $0x48] sm:$0xff]  ;;  %v394_v62 = vld [vmem:[#allocation2 + $0x98] sm:$0xff] }
  0x3a   : > { %712 = vmatprep.subr.mxu0 %v458_v30  ;;  %647 = vmatprep.subr.mxu1 %v432_v37  ;;  %v383_v63 = vld [vmem:[#allocation2 + $0x40] sm:$0xff]  ;;  %v393_v0 = vld [vmem:[#allocation2 + $0x90] sm:$0xff]  ;;  %v376_v1 = vld [vmem:[#allocation2 + $0x8] sm:$0xff] }
  0x3b   : > { %713 = vmatpush1.msra.mxu0 %v457_v32  ;;  %648 = vmatpush1.msra.mxu1 %v431_v39  ;;  %v386_v2 = vld [vmem:[#allocation2 + $0x58] sm:$0xff]  ;;  %v375_v3 = vld [vmem:[#allocation2] sm:$0xff]  ;;  %v385_v4 = vld [vmem:[#allocation2 + $0x50] sm:$0xff] }
  0x3c   : > { %714 = vmatprep.subr.mxu0 %v450_v34  ;;  %649 = vmatprep.subr.mxu1 %v424_v41  ;;  %v624_v5 = vld [vmem:[#allocation2 + $0x7c8] sm:$0xff]  ;;  %v378_v6 = vld [vmem:[#allocation2 + $0x18] sm:$0xff]  ;;  %v623_v7 = vld [vmem:[#allocation2 + $0x7c0] sm:$0xff] }
  0x3d   : > { %715 = vmatpush1.msra.mxu0 %v449_v36  ;;  %650 = vmatpush1.msra.mxu1 %v423_v43  ;;  %v377_v8 = vld [vmem:[#allocation2 + $0x10] sm:$0xff]  ;;  %v616_v9 = vld [vmem:[#allocation2 + $0x788] sm:$0xff]  ;;  %v626_v10 = vld [vmem:[#allocation2 + $0x7d8] sm:$0xff] }
  0x3e   : > { %716 = vmatprep.subr.mxu0 %v442_v38  ;;  %651 = vmatprep.subr.mxu1 %v416_v45  ;;  %v615_v11 = vld [vmem:[#allocation2 + $0x780] sm:$0xff]  ;;  %v625_v12 = vld [vmem:[#allocation2 + $0x7d0] sm:$0xff]  ;;  %v608_v13 = vld [vmem:[#allocation2 + $0x748] sm:$0xff] }
  0x3f   : > { %717 = vmatpush1.msra.mxu0 %v441_v40  ;;  %652 = vmatpush1.msra.mxu1 %v415_v47  ;;  %v618_v14 = vld [vmem:[#allocation2 + $0x798] sm:$0xff]  ;;  %v607_v15 = vld [vmem:[#allocation2 + $0x740] sm:$0xff]  ;;  %v617_v16 = vld [vmem:[#allocation2 + $0x790] sm:$0xff] }
  0x40   : > { %718 = vmatprep.subr.mxu0 %v434_v42  ;;  %653 = vmatprep.subr.mxu1 %v408_v49  ;;  %v600_v17 = vld [vmem:[#allocation2 + $0x708] sm:$0xff]  ;;  %v610_v18 = vld [vmem:[#allocation2 + $0x758] sm:$0xff]  ;;  %v599_v19 = vld [vmem:[#allocation2 + $0x700] sm:$0xff] }
  0x41   : > { %719 = vmatpush1.msra.mxu0 %v433_v44  ;;  %654 = vmatpush1.msra.mxu1 %v407_v51  ;;  %v609_v20 = vld [vmem:[#allocation2 + $0x750] sm:$0xff]  ;;  %v592_v21 = vld [vmem:[#allocation2 + $0x6c8] sm:$0xff]  ;;  %v602_v22 = vld [vmem:[#allocation2 + $0x718] sm:$0xff] }
  0x42   : > { %720 = vmatprep.subr.mxu0 %v426_v46  ;;  %655 = vmatprep.subr.mxu1 %v400_v53  ;;  %v591_v23 = vld [vmem:[#allocation2 + $0x6c0] sm:$0xff]  ;;  %v601_v24 = vld [vmem:[#allocation2 + $0x710] sm:$0xff]  ;;  %v584_v25 = vld [vmem:[#allocation2 + $0x688] sm:$0xff] }
  0x43   : > { %721 = vmatpush1.msra.mxu0 %v425_v48  ;;  %656 = vmatpush1.msra.mxu1 %v399_v55  ;;  %v594_v26 = vld [vmem:[#allocation2 + $0x6d8] sm:$0xff]  ;;  %v583_v27 = vld [vmem:[#allocation2 + $0x680] sm:$0xff]  ;;  %v593_v28 = vld [vmem:[#allocation2 + $0x6d0] sm:$0xff] }
  0x44   : > { %722 = vmatprep.subr.mxu0 %v418_v50  ;;  %657 = vmatprep.subr.mxu1 %v392_v57  ;;  %v576_v29 = vld [vmem:[#allocation2 + $0x648] sm:$0xff]  ;;  %v586_v30 = vld [vmem:[#allocation2 + $0x698] sm:$0xff]  ;;  %v575_v31 = vld [vmem:[#allocation2 + $0x640] sm:$0xff] }
  0x45   : > { %723 = vmatpush1.msra.mxu0 %v417_v52  ;;  %658 = vmatpush1.msra.mxu1 %v391_v59  ;;  %v585_v32 = vld [vmem:[#allocation2 + $0x690] sm:$0xff]  ;;  %v568_v33 = vld [vmem:[#allocation2 + $0x608] sm:$0xff]  ;;  %v578_v34 = vld [vmem:[#allocation2 + $0x658] sm:$0xff] }
  0x46   : > { %724 = vmatprep.subr.mxu0 %v410_v54  ;;  %659 = vmatprep.subr.mxu1 %v384_v61  ;;  %v567_v35 = vld [vmem:[#allocation2 + $0x600] sm:$0xff]  ;;  %v577_v36 = vld [vmem:[#allocation2 + $0x650] sm:$0xff]  ;;  %v560_v37 = vld [vmem:[#allocation2 + $0x5c8] sm:$0xff] }
  0x47   : > { %725 = vmatpush1.msra.mxu0 %v409_v56  ;;  %660 = vmatpush1.msra.mxu1 %v383_v63  ;;  %v570_v38 = vld [vmem:[#allocation2 + $0x618] sm:$0xff]  ;;  %v559_v39 = vld [vmem:[#allocation2 + $0x5c0] sm:$0xff]  ;;  %v569_v40 = vld [vmem:[#allocation2 + $0x610] sm:$0xff] }
  0x48   : > { %726 = vmatprep.subr.mxu0 %v402_v58  ;;  %661 = vmatprep.subr.mxu1 %v376_v1  ;;  %v552_v41 = vld [vmem:[#allocation2 + $0x588] sm:$0xff]  ;;  %v562_v42 = vld [vmem:[#allocation2 + $0x5d8] sm:$0xff]  ;;  %v551_v43 = vld [vmem:[#allocation2 + $0x580] sm:$0xff] }
  0x49   : > { %727 = vmatpush1.msra.mxu0 %v401_v60  ;;  %662 = vmatpush1.msra.mxu1 %v375_v3  ;;  %v561_v44 = vld [vmem:[#allocation2 + $0x5d0] sm:$0xff]  ;;  %v544_v45 = vld [vmem:[#allocation2 + $0x548] sm:$0xff]  ;;  %v554_v46 = vld [vmem:[#allocation2 + $0x598] sm:$0xff] }
  0x4a   : > { %728 = vmatprep.subr.mxu0 %v394_v62  ;;  %663 = vmatprep.subr.mxu1 %v624_v5  ;;  %v543_v47 = vld [vmem:[#allocation2 + $0x540] sm:$0xff]  ;;  %v553_v48 = vld [vmem:[#allocation2 + $0x590] sm:$0xff]  ;;  %v536_v49 = vld [vmem:[#allocation2 + $0x508] sm:$0xff] }
  0x4b   : > { %729 = vmatpush1.msra.mxu0 %v393_v0  ;;  %664 = vmatpush2.msra.mxu1 %v623_v7  ;;  %v546_v50 = vld [vmem:[#allocation2 + $0x558] sm:$0xff]  ;;  %v545_v51 = vld [vmem:[#allocation2 + $0x550] sm:$0xff]  ;;  %v535_v53 = vld [vmem:[#allocation2 + $0x500] sm:$0xff] }
  0x4c   : > { %730 = vmatprep.subr.mxu0 %v386_v2  ;;  %665 = vmatprep.subr.mxu1 %v616_v9  ;;  %v538_v52 = vld [vmem:[#allocation2 + $0x518] sm:$0xff]  ;;  %v537_v54 = vld [vmem:[#allocation2 + $0x510] sm:$0xff]  ;;  %v528_v55 = vld [vmem:[#allocation2 + $0x4c8] sm:$0xff] }
  0x4d   : > { %731 = vmatpush1.msra.mxu0 %v385_v4  ;;  %666 = vmatpush2.msra.mxu1 %v615_v11  ;;  %v530_v56 = vld [vmem:[#allocation2 + $0x4d8] sm:$0xff]  ;;  %v527_v57 = vld [vmem:[#allocation2 + $0x4c0] sm:$0xff]  ;;  %v529_v58 = vld [vmem:[#allocation2 + $0x4d0] sm:$0xff] }
  0x4e   : > { %732 = vmatprep.subr.mxu0 %v378_v6  ;;  %667 = vmatprep.subr.mxu1 %v608_v13  ;;  %v520_v59 = vld [vmem:[#allocation2 + $0x488] sm:$0xff]  ;;  %v522_v60 = vld [vmem:[#allocation2 + $0x498] sm:$0xff]  ;;  %v519_v61 = vld [vmem:[#allocation2 + $0x480] sm:$0xff] }
  0x4f   : > { %733 = vmatpush1.msra.mxu0 %v377_v8  ;;  %668 = vmatpush2.msra.mxu1 %v607_v15  ;;  %v521_v62 = vld [vmem:[#allocation2 + $0x490] sm:$0xff]  ;;  %v512_v63 = vld [vmem:[#allocation2 + $0x448] sm:$0xff]  ;;  %v514_v0 = vld [vmem:[#allocation2 + $0x458] sm:$0xff] }
  0x50   : > { %734 = vmatprep.subr.mxu0 %v626_v10  ;;  %669 = vmatprep.subr.mxu1 %v600_v17  ;;  %v511_v1 = vld [vmem:[#allocation2 + $0x440] sm:$0xff]  ;;  %v513_v2 = vld [vmem:[#allocation2 + $0x450] sm:$0xff]  ;;  %v504_v3 = vld [vmem:[#allocation2 + $0x408] sm:$0xff] }
  0x51   : > { %735 = vmatpush2.msra.mxu0 %v625_v12  ;;  %670 = vmatpush2.msra.mxu1 %v599_v19  ;;  %v506_v4 = vld [vmem:[#allocation2 + $0x418] sm:$0xff]  ;;  %v503_v5 = vld [vmem:[#allocation2 + $0x400] sm:$0xff]  ;;  %v505_v6 = vld [vmem:[#allocation2 + $0x410] sm:$0xff] }
  0x52   : > { %736 = vmatprep.subr.mxu0 %v618_v14  ;;  %671 = vmatprep.subr.mxu1 %v592_v21  ;;  %v500_v7 = vld [vmem:[#allocation2 + $0x3e8] sm:$0xff]  ;;  %v502_v8 = vld [vmem:[#allocation2 + $0x3f8] sm:$0xff]  ;;  %v501_v21 = vld [vmem:[#allocation2 + $0x3f0] sm:$0xff] }
  0x53   : > { %737 = vmatpush2.msra.mxu0 %v617_v16  ;;  %672 = vmatpush2.msra.mxu1 %v591_v23  ;;  %v492_v23 = vld [vmem:[#allocation2 + $0x3a8] sm:$0xff] }
  0x54   : > { %738 = vmatprep.subr.mxu0 %v610_v18  ;;  %673 = vmatprep.subr.mxu1 %v584_v25  ;;  %v491_v25 = vld [vmem:[#allocation2 + $0x3a0] sm:$0xff] }
  0x55   : > { %739 = vmatpush2.msra.mxu0 %v609_v20  ;;  %674 = vmatpush2.msra.mxu1 %v583_v27  ;;  %v499_v20 = vld [vmem:[#allocation2 + $0x3e0] sm:$0xff]  ;;  %v484_v27 = vld [vmem:[#allocation2 + $0x368] sm:$0xff] }
  0x56   : > { %740 = vmatprep.subr.mxu0 %v602_v22  ;;  %675 = vmatprep.subr.mxu1 %v576_v29  ;;  %v483_v29 = vld [vmem:[#allocation2 + $0x360] sm:$0xff] }
  0x57   : > { %741 = vmatpush2.msra.mxu0 %v601_v24  ;;  %676 = vmatpush2.msra.mxu1 %v575_v31  ;;  %v494_v24 = vld [vmem:[#allocation2 + $0x3b8] sm:$0xff]  ;;  %v476_v31 = vld [vmem:[#allocation2 + $0x328] sm:$0xff] }
  0x58   : > { %742 = vmatprep.subr.mxu0 %v594_v26  ;;  %677 = vmatprep.subr.mxu1 %v568_v33  ;;  %v493_v26 = vld [vmem:[#allocation2 + $0x3b0] sm:$0xff]  ;;  %v475_v33 = vld [vmem:[#allocation2 + $0x320] sm:$0xff] }
  0x59   : > { %743 = vmatpush2.msra.mxu0 %v593_v28  ;;  %678 = vmatpush2.msra.mxu1 %v567_v35  ;;  %v486_v28 = vld [vmem:[#allocation2 + $0x378] sm:$0xff]  ;;  %v468_v35 = vld [vmem:[#allocation2 + $0x2e8] sm:$0xff] }
  0x5a   : > { %744 = vmatprep.subr.mxu0 %v586_v30  ;;  %679 = vmatprep.subr.mxu1 %v560_v37  ;;  %v485_v30 = vld [vmem:[#allocation2 + $0x370] sm:$0xff]  ;;  %v467_v37 = vld [vmem:[#allocation2 + $0x2e0] sm:$0xff] }
  0x5b   : > { %745 = vmatpush2.msra.mxu0 %v585_v32  ;;  %680 = vmatpush2.msra.mxu1 %v559_v39  ;;  %v478_v32 = vld [vmem:[#allocation2 + $0x338] sm:$0xff]  ;;  %v460_v39 = vld [vmem:[#allocation2 + $0x2a8] sm:$0xff] }
  0x5c   : > { %746 = vmatprep.subr.mxu0 %v578_v34  ;;  %681 = vmatprep.subr.mxu1 %v552_v41  ;;  %v477_v34 = vld [vmem:[#allocation2 + $0x330] sm:$0xff]  ;;  %v459_v41 = vld [vmem:[#allocation2 + $0x2a0] sm:$0xff] }
  0x5d   : > { %747 = vmatpush2.msra.mxu0 %v577_v36  ;;  %682 = vmatpush2.msra.mxu1 %v551_v43  ;;  %v470_v36 = vld [vmem:[#allocation2 + $0x2f8] sm:$0xff]  ;;  %v452_v43 = vld [vmem:[#allocation2 + $0x268] sm:$0xff] }
  0x5e   : > { %748 = vmatprep.subr.mxu0 %v570_v38  ;;  %683 = vmatprep.subr.mxu1 %v544_v45  ;;  %v469_v38 = vld [vmem:[#allocation2 + $0x2f0] sm:$0xff]  ;;  %v451_v45 = vld [vmem:[#allocation2 + $0x260] sm:$0xff] }
  0x5f   : > { %749 = vmatpush2.msra.mxu0 %v569_v40  ;;  %684 = vmatpush2.msra.mxu1 %v543_v47  ;;  %v462_v40 = vld [vmem:[#allocation2 + $0x2b8] sm:$0xff]  ;;  %v444_v47 = vld [vmem:[#allocation2 + $0x228] sm:$0xff] }
  0x60   : > { %750 = vmatprep.subr.mxu0 %v562_v42  ;;  %685 = vmatprep.subr.mxu1 %v536_v49  ;;  %v461_v42 = vld [vmem:[#allocation2 + $0x2b0] sm:$0xff]  ;;  %v443_v49 = vld [vmem:[#allocation2 + $0x220] sm:$0xff] }
  0x61   : > { %751 = vmatpush2.msra.mxu0 %v561_v44  ;;  %686 = vmatpush2.msra.mxu1 %v535_v53  ;;  %v454_v44 = vld [vmem:[#allocation2 + $0x278] sm:$0xff]  ;;  %v435_v53 = vld [vmem:[#allocation2 + $0x1e0] sm:$0xff] }
  0x62   : > { %752 = vmatprep.subr.mxu0 %v554_v46  ;;  %687 = vmatprep.subr.mxu1 %v528_v55  ;;  %v453_v46 = vld [vmem:[#allocation2 + $0x270] sm:$0xff]  ;;  %v428_v55 = vld [vmem:[#allocation2 + $0x1a8] sm:$0xff] }
  0x63   : > { %753 = vmatpush2.msra.mxu0 %v553_v48  ;;  %688 = vmatpush2.msra.mxu1 %v527_v57  ;;  %v446_v48 = vld [vmem:[#allocation2 + $0x238] sm:$0xff]  ;;  %v427_v57 = vld [vmem:[#allocation2 + $0x1a0] sm:$0xff] }
  0x64   : > { %754 = vmatprep.subr.mxu0 %v546_v50  ;;  %689 = vmatprep.subr.mxu1 %v520_v59  ;;  %v445_v50 = vld [vmem:[#allocation2 + $0x230] sm:$0xff]  ;;  %v420_v59 = vld [vmem:[#allocation2 + $0x168] sm:$0xff] }
  0x65   : > { %755 = vmatpush2.msra.mxu0 %v545_v51  ;;  %690 = vmatpush2.msra.mxu1 %v519_v61  ;;  %v436_v51 = vld [vmem:[#allocation2 + $0x1e8] sm:$0xff]  ;;  %v419_v61 = vld [vmem:[#allocation2 + $0x160] sm:$0xff] }
  0x66   : > { %756 = vmatprep.subr.mxu0 %v538_v52  ;;  %691 = vmatprep.subr.mxu1 %v512_v63  ;;  %v438_v52 = vld [vmem:[#allocation2 + $0x1f8] sm:$0xff]  ;;  %v412_v63 = vld [vmem:[#allocation2 + $0x128] sm:$0xff] }
  0x67   : > { %757 = vmatpush2.msra.mxu0 %v537_v54  ;;  %692 = vmatpush2.msra.mxu1 %v511_v1  ;;  %v437_v54 = vld [vmem:[#allocation2 + $0x1f0] sm:$0xff]  ;;  %v411_v1 = vld [vmem:[#allocation2 + $0x120] sm:$0xff] }
  0x68   : > { %758 = vmatprep.subr.mxu0 %v530_v56  ;;  %693 = vmatprep.subr.mxu1 %v504_v3  ;;  %v430_v56 = vld [vmem:[#allocation2 + $0x1b8] sm:$0xff]  ;;  %v404_v3 = vld [vmem:[#allocation2 + $0xe8] sm:$0xff] }
  0x69   : > { %759 = vmatpush2.msra.mxu0 %v529_v58  ;;  %694 = vmatpush2.msra.mxu1 %v503_v5  ;;  %v429_v58 = vld [vmem:[#allocation2 + $0x1b0] sm:$0xff]  ;;  %v403_v5 = vld [vmem:[#allocation2 + $0xe0] sm:$0xff] }
  0x6a   : > { %760 = vmatprep.subr.mxu0 %v522_v60  ;;  %773 = vmatprep.subr.mxu1 %v500_v7  ;;  %v422_v60 = vld [vmem:[#allocation2 + $0x178] sm:$0xff]  ;;  %v396_v7 = vld [vmem:[#allocation2 + $0xa8] sm:$0xff] }
  0x6b   : > { %761 = vmatpush2.msra.mxu0 %v521_v62  ;;  %v421_v62 = vld [vmem:[#allocation2 + $0x170] sm:$0xff] }
  0x6c   : > { %762 = vmatprep.subr.mxu0 %v514_v0  ;;  %v414_v0 = vld [vmem:[#allocation2 + $0x138] sm:$0xff] }
  0x6d   : > { %763 = vmatpush2.msra.mxu0 %v513_v2  ;;  %v413_v2 = vld [vmem:[#allocation2 + $0x130] sm:$0xff] }
  0x6e   : > { %764 = vmatprep.subr.mxu0 %v506_v4  ;;  %v406_v4 = vld [vmem:[#allocation2 + $0xf8] sm:$0xff] }
  0x6f   : > { %765 = vmatpush2.msra.mxu0 %v505_v6  ;;  %v405_v6 = vld [vmem:[#allocation2 + $0xf0] sm:$0xff] }
  0x70   : > { %844 = vmatprep.subr.mxu0 %v502_v8  ;;  %v398_v8 = vld [vmem:[#allocation2 + $0xb8] sm:$0xff] }
  0xa2   : > { %v357_v9 = vpop.permute.xlu0 %356 }
  0xa6   : > { %v365_v12 = vpop.permute.xlu0 %364 }
  0xf0   : > { %v348_v10 = vpop.f32.mrf.mxu0 }
  0xf1   : > { %v359_v11 = vmul.f32 %v357_v9, %v348_v10  ;;  %v397_v10 = vld [vmem:[#allocation2 + $0xb0] sm:$0xff] }
  0xf2   : > { %v350_v13 = vpop.f32.mrf.mxu0 }
  0xf3   : > { %v367_v14 = vadd.f32 %v365_v12, %v359_v11  ;;  %v360_v15 = vmul.f32 %v357_v9, %v350_v13  ;;  %v395_v9 = vld [vmem:[#allocation2 + $0xa0] sm:$0xff]  ;;  %v388_v11 = vld [vmem:[#allocation2 + $0x68] sm:$0xff] }
  0xf4   : > { %v387_v13 = vld [vmem:[#allocation2 + $0x60] sm:$0xff] }
  0xf5   : > { %v368_v16 = vadd.f32 %v365_v12, %v360_v15  ;;  %v371_v17 = vmul.f32 0.1, %v367_v14  ;;  %vm369_vm3 = vcmp.gt.f32.partialorder %v367_v14, 0.0  ;;  %v390_v12 = vld [vmem:[#allocation2 + $0x78] sm:$0xff]  ;;  %v380_v15 = vld [vmem:[#allocation2 + $0x28] sm:$0xff] }
  0xf7   : > { %v372_v18 = vmul.f32 0.1, %v368_v16  ;;  %vm370_vm2 = vcmp.gt.f32.partialorder %v368_v16, 0.0  ;;  %v1354_v22 = vsel %vm369_vm3, %v367_v14, %v371_v17  ;;  %v389_v14 = vld [vmem:[#allocation2 + $0x70] sm:$0xff]  ;;  %v379_v17 = vld [vmem:[#allocation2 + $0x20] sm:$0xff] }
  0xf9   : > { %v374_v19 = vsel %vm370_vm2, %v368_v16, %v372_v18  ;;  %v382_v16 = vld [vmem:[#allocation2 + $0x38] sm:$0xff]  ;;  %v381_v18 = vld [vmem:[#allocation2 + $0x30] sm:$0xff] }
  0xfa   : > { %695 = vmatprep.mubr.f32.mxu1 %v374_v19  ;;  %766 = vmatprep.mubr.f32.mxu0 %v374_v19 }
  0xfb   : > { %696 = vmatmul.mubr.f32.vlgmr.msra.gmra.mxu1 %v1354_v22  ;;  %767 = vmatmul.mubr.f32.vlgmr.msra.gmra.mxu0 %v1354_v22 }
  0xfc   : > { %774 = vmatpush1.msra.mxu1 %v499_v20  ;;  %845 = vmatpush1.msra.mxu0 %v501_v21  ;;  %v630_v20 = vld [vmem:[#allocation2 + $0x7f8] sm:$0xff]  ;;  %v627_v21 = vld [vmem:[#allocation2 + $0x7e0] sm:$0xff] }
  0xfd   : > { %775 = vmatprep.subr.mxu1 %v492_v23  ;;  %837 = vmatprep.mubr.f32.mxu1 %v374_v19  ;;  %v629_v23 = vld [vmem:[#allocation2 + $0x7f0] sm:$0xff] }
  0xfe   : > { %846 = vmatprep.subr.mxu0 %v494_v24  ;;  %908 = vmatprep.mubr.f32.mxu0 %v374_v19  ;;  %v628_v19 = vld [vmem:[#allocation2 + $0x7e8] sm:$0xff] }
  0xff   : > { %776 = vmatpush1.msra.mxu1 %v491_v25  ;;  %847 = vmatpush1.msra.mxu0 %v493_v26  ;;  %v620_v24 = vld [vmem:[#allocation2 + $0x7a8] sm:$0xff]  ;;  %v622_v25 = vld [vmem:[#allocation2 + $0x7b8] sm:$0xff]  ;;  %v619_v26 = vld [vmem:[#allocation2 + $0x7a0] sm:$0xff] }
 0x100   : > { %777 = vmatprep.subr.mxu1 %v484_v27  ;;  %848 = vmatprep.subr.mxu0 %v486_v28  ;;  %v621_v27 = vld [vmem:[#allocation2 + $0x7b0] sm:$0xff]  ;;  %v612_v28 = vld [vmem:[#allocation2 + $0x768] sm:$0xff] }
 0x101   : > { %778 = vmatpush1.msra.mxu1 %v483_v29  ;;  %849 = vmatpush1.msra.mxu0 %v485_v30  ;;  %v614_v29 = vld [vmem:[#allocation2 + $0x778] sm:$0xff]  ;;  %v611_v30 = vld [vmem:[#allocation2 + $0x760] sm:$0xff] }
 0x102   : > { %779 = vmatprep.subr.mxu1 %v476_v31  ;;  %850 = vmatprep.subr.mxu0 %v478_v32  ;;  %v613_v31 = vld [vmem:[#allocation2 + $0x770] sm:$0xff]  ;;  %v604_v32 = vld [vmem:[#allocation2 + $0x728] sm:$0xff] }
 0x103   : > { %780 = vmatpush1.msra.mxu1 %v475_v33  ;;  %851 = vmatpush1.msra.mxu0 %v477_v34  ;;  %v606_v33 = vld [vmem:[#allocation2 + $0x738] sm:$0xff]  ;;  %v603_v34 = vld [vmem:[#allocation2 + $0x720] sm:$0xff] }
 0x104   : > { %781 = vmatprep.subr.mxu1 %v468_v35  ;;  %852 = vmatprep.subr.mxu0 %v470_v36  ;;  %v605_v35 = vld [vmem:[#allocation2 + $0x730] sm:$0xff]  ;;  %v596_v36 = vld [vmem:[#allocation2 + $0x6e8] sm:$0xff] }
 0x105   : > { %782 = vmatpush1.msra.mxu1 %v467_v37  ;;  %853 = vmatpush1.msra.mxu0 %v469_v38  ;;  %v598_v37 = vld [vmem:[#allocation2 + $0x6f8] sm:$0xff]  ;;  %v595_v38 = vld [vmem:[#allocation2 + $0x6e0] sm:$0xff] }
 0x106   : > { %783 = vmatprep.subr.mxu1 %v460_v39  ;;  %854 = vmatprep.subr.mxu0 %v462_v40  ;;  %v597_v39 = vld [vmem:[#allocation2 + $0x6f0] sm:$0xff]  ;;  %v588_v40 = vld [vmem:[#allocation2 + $0x6a8] sm:$0xff] }
 0x107   : > { %784 = vmatpush1.msra.mxu1 %v459_v41  ;;  %855 = vmatpush1.msra.mxu0 %v461_v42  ;;  %v590_v41 = vld [vmem:[#allocation2 + $0x6b8] sm:$0xff]  ;;  %v587_v42 = vld [vmem:[#allocation2 + $0x6a0] sm:$0xff] }
 0x108   : > { %785 = vmatprep.subr.mxu1 %v452_v43  ;;  %856 = vmatprep.subr.mxu0 %v454_v44  ;;  %v589_v43 = vld [vmem:[#allocation2 + $0x6b0] sm:$0xff]  ;;  %v580_v44 = vld [vmem:[#allocation2 + $0x668] sm:$0xff] }
 0x109   : > { %786 = vmatpush1.msra.mxu1 %v451_v45  ;;  %857 = vmatpush1.msra.mxu0 %v453_v46  ;;  %v582_v45 = vld [vmem:[#allocation2 + $0x678] sm:$0xff]  ;;  %v579_v46 = vld [vmem:[#allocation2 + $0x660] sm:$0xff] }
 0x10a   : > { %787 = vmatprep.subr.mxu1 %v444_v47  ;;  %858 = vmatprep.subr.mxu0 %v446_v48  ;;  %v581_v47 = vld [vmem:[#allocation2 + $0x670] sm:$0xff]  ;;  %v572_v48 = vld [vmem:[#allocation2 + $0x628] sm:$0xff] }
 0x10b   : > { %788 = vmatpush1.msra.mxu1 %v443_v49  ;;  %859 = vmatpush1.msra.mxu0 %v445_v50  ;;  %v574_v49 = vld [vmem:[#allocation2 + $0x638] sm:$0xff]  ;;  %v571_v50 = vld [vmem:[#allocation2 + $0x620] sm:$0xff] }
 0x10c   : > { %789 = vmatprep.subr.mxu1 %v436_v51  ;;  %860 = vmatprep.subr.mxu0 %v438_v52  ;;  %v573_v51 = vld [vmem:[#allocation2 + $0x630] sm:$0xff]  ;;  %v564_v52 = vld [vmem:[#allocation2 + $0x5e8] sm:$0xff] }
 0x10d   : > { %790 = vmatpush1.msra.mxu1 %v435_v53  ;;  %861 = vmatpush1.msra.mxu0 %v437_v54  ;;  %v566_v53 = vld [vmem:[#allocation2 + $0x5f8] sm:$0xff]  ;;  %v563_v54 = vld [vmem:[#allocation2 + $0x5e0] sm:$0xff] }
 0x10e   : > { %791 = vmatprep.subr.mxu1 %v428_v55  ;;  %862 = vmatprep.subr.mxu0 %v430_v56  ;;  %v565_v55 = vld [vmem:[#allocation2 + $0x5f0] sm:$0xff]  ;;  %v556_v56 = vld [vmem:[#allocation2 + $0x5a8] sm:$0xff] }
 0x10f   : > { %792 = vmatpush1.msra.mxu1 %v427_v57  ;;  %863 = vmatpush1.msra.mxu0 %v429_v58  ;;  %v558_v57 = vld [vmem:[#allocation2 + $0x5b8] sm:$0xff]  ;;  %v555_v58 = vld [vmem:[#allocation2 + $0x5a0] sm:$0xff] }
 0x110   : > { %793 = vmatprep.subr.mxu1 %v420_v59  ;;  %864 = vmatprep.subr.mxu0 %v422_v60  ;;  %v557_v59 = vld [vmem:[#allocation2 + $0x5b0] sm:$0xff]  ;;  %v548_v60 = vld [vmem:[#allocation2 + $0x568] sm:$0xff] }
 0x111   : > { %794 = vmatpush1.msra.mxu1 %v419_v61  ;;  %865 = vmatpush1.msra.mxu0 %v421_v62  ;;  %v550_v61 = vld [vmem:[#allocation2 + $0x578] sm:$0xff]  ;;  %v547_v62 = vld [vmem:[#allocation2 + $0x560] sm:$0xff] }
 0x112   : > { %795 = vmatprep.subr.mxu1 %v412_v63  ;;  %866 = vmatprep.subr.mxu0 %v414_v0  ;;  %v549_v63 = vld [vmem:[#allocation2 + $0x570] sm:$0xff]  ;;  %v540_v0 = vld [vmem:[#allocation2 + $0x528] sm:$0xff] }
 0x113   : > { %796 = vmatpush1.msra.mxu1 %v411_v1  ;;  %867 = vmatpush1.msra.mxu0 %v413_v2  ;;  %v542_v1 = vld [vmem:[#allocation2 + $0x538] sm:$0xff]  ;;  %v539_v2 = vld [vmem:[#allocation2 + $0x520] sm:$0xff] }
 0x114   : > { %797 = vmatprep.subr.mxu1 %v404_v3  ;;  %868 = vmatprep.subr.mxu0 %v406_v4  ;;  %v541_v3 = vld [vmem:[#allocation2 + $0x530] sm:$0xff]  ;;  %v532_v4 = vld [vmem:[#allocation2 + $0x4e8] sm:$0xff] }
 0x115   : > { %798 = vmatpush1.msra.mxu1 %v403_v5  ;;  %869 = vmatpush1.msra.mxu0 %v405_v6  ;;  %v534_v5 = vld [vmem:[#allocation2 + $0x4f8] sm:$0xff]  ;;  %v531_v6 = vld [vmem:[#allocation2 + $0x4e0] sm:$0xff] }
 0x116   : > { %799 = vmatprep.subr.mxu1 %v396_v7  ;;  %870 = vmatprep.subr.mxu0 %v398_v8  ;;  %v533_v7 = vld [vmem:[#allocation2 + $0x4f0] sm:$0xff]  ;;  %v524_v8 = vld [vmem:[#allocation2 + $0x4a8] sm:$0xff] }
 0x117   : > { %800 = vmatpush1.msra.mxu1 %v395_v9  ;;  %871 = vmatpush1.msra.mxu0 %v397_v10  ;;  %v526_v9 = vld [vmem:[#allocation2 + $0x4b8] sm:$0xff]  ;;  %v523_v10 = vld [vmem:[#allocation2 + $0x4a0] sm:$0xff] }
 0x118   : > { %801 = vmatprep.subr.mxu1 %v388_v11  ;;  %872 = vmatprep.subr.mxu0 %v390_v12  ;;  %v525_v11 = vld [vmem:[#allocation2 + $0x4b0] sm:$0xff]  ;;  %v516_v12 = vld [vmem:[#allocation2 + $0x468] sm:$0xff] }
 0x119   : > { %802 = vmatpush1.msra.mxu1 %v387_v13  ;;  %873 = vmatpush1.msra.mxu0 %v389_v14  ;;  %v518_v13 = vld [vmem:[#allocation2 + $0x478] sm:$0xff]  ;;  %v515_v14 = vld [vmem:[#allocation2 + $0x460] sm:$0xff] }
 0x11a   : > { %803 = vmatprep.subr.mxu1 %v380_v15  ;;  %874 = vmatprep.subr.mxu0 %v382_v16  ;;  %v517_v15 = vld [vmem:[#allocation2 + $0x470] sm:$0xff]  ;;  %v508_v16 = vld [vmem:[#allocation2 + $0x428] sm:$0xff] }
 0x11b   : > { %804 = vmatpush1.msra.mxu1 %v379_v17  ;;  %875 = vmatpush1.msra.mxu0 %v381_v18  ;;  %v510_v17 = vld [vmem:[#allocation2 + $0x438] sm:$0xff]  ;;  %v507_v18 = vld [vmem:[#allocation2 + $0x420] sm:$0xff] }
 0x11c   : > { %805 = vmatprep.subr.mxu1 %v628_v19  ;;  %876 = vmatprep.subr.mxu0 %v630_v20  ;;  %v509_v19 = vld [vmem:[#allocation2 + $0x430] sm:$0xff] }
 0x11d   : > { %806 = vmatpush2.msra.mxu1 %v627_v21  ;;  %877 = vmatpush2.msra.mxu0 %v629_v23 }
 0x11e   : > { %807 = vmatprep.subr.mxu1 %v620_v24  ;;  %878 = vmatprep.subr.mxu0 %v622_v25 }
 0x11f   : > { %808 = vmatpush2.msra.mxu1 %v619_v26  ;;  %879 = vmatpush2.msra.mxu0 %v621_v27 }
 0x120   : > { %809 = vmatprep.subr.mxu1 %v612_v28  ;;  %880 = vmatprep.subr.mxu0 %v614_v29 }
 0x121   : > { %810 = vmatpush2.msra.mxu1 %v611_v30  ;;  %881 = vmatpush2.msra.mxu0 %v613_v31 }
 0x122   : > { %811 = vmatprep.subr.mxu1 %v604_v32  ;;  %882 = vmatprep.subr.mxu0 %v606_v33 }
 0x123   : > { %812 = vmatpush2.msra.mxu1 %v603_v34  ;;  %883 = vmatpush2.msra.mxu0 %v605_v35 }
 0x124   : > { %813 = vmatprep.subr.mxu1 %v596_v36  ;;  %884 = vmatprep.subr.mxu0 %v598_v37 }
 0x125   : > { %814 = vmatpush2.msra.mxu1 %v595_v38  ;;  %885 = vmatpush2.msra.mxu0 %v597_v39 }
 0x126   : > { %815 = vmatprep.subr.mxu1 %v588_v40  ;;  %886 = vmatprep.subr.mxu0 %v590_v41 }
 0x127   : > { %816 = vmatpush2.msra.mxu1 %v587_v42  ;;  %887 = vmatpush2.msra.mxu0 %v589_v43 }
 0x128   : > { %817 = vmatprep.subr.mxu1 %v580_v44  ;;  %888 = vmatprep.subr.mxu0 %v582_v45 }
 0x129   : > { %818 = vmatpush2.msra.mxu1 %v579_v46  ;;  %889 = vmatpush2.msra.mxu0 %v581_v47 }
 0x12a   : > { %819 = vmatprep.subr.mxu1 %v572_v48  ;;  %890 = vmatprep.subr.mxu0 %v574_v49 }
 0x12b   : > { %820 = vmatpush2.msra.mxu1 %v571_v50  ;;  %891 = vmatpush2.msra.mxu0 %v573_v51 }
 0x12c   : > { %821 = vmatprep.subr.mxu1 %v564_v52  ;;  %892 = vmatprep.subr.mxu0 %v566_v53 }
 0x12d   : > { %822 = vmatpush2.msra.mxu1 %v563_v54  ;;  %893 = vmatpush2.msra.mxu0 %v565_v55 }
 0x12e   : > { %823 = vmatprep.subr.mxu1 %v556_v56  ;;  %894 = vmatprep.subr.mxu0 %v558_v57 }
 0x12f   : > { %824 = vmatpush2.msra.mxu1 %v555_v58  ;;  %895 = vmatpush2.msra.mxu0 %v557_v59 }
 0x130   : > { %825 = vmatprep.subr.mxu1 %v548_v60  ;;  %896 = vmatprep.subr.mxu0 %v550_v61 }
 0x131   : > { %826 = vmatpush2.msra.mxu1 %v547_v62  ;;  %897 = vmatpush2.msra.mxu0 %v549_v63 }
 0x132   : > { %827 = vmatprep.subr.mxu1 %v540_v0  ;;  %898 = vmatprep.subr.mxu0 %v542_v1 }
 0x133   : > { %828 = vmatpush2.msra.mxu1 %v539_v2  ;;  %899 = vmatpush2.msra.mxu0 %v541_v3 }
 0x134   : > { %829 = vmatprep.subr.mxu1 %v532_v4  ;;  %900 = vmatprep.subr.mxu0 %v534_v5 }
 0x135   : > { %830 = vmatpush2.msra.mxu1 %v531_v6  ;;  %901 = vmatpush2.msra.mxu0 %v533_v7 }
 0x136   : > { %831 = vmatprep.subr.mxu1 %v524_v8  ;;  %902 = vmatprep.subr.mxu0 %v526_v9 }
 0x137   : > { %832 = vmatpush2.msra.mxu1 %v523_v10  ;;  %903 = vmatpush2.msra.mxu0 %v525_v11 }
 0x138   : > { %833 = vmatprep.subr.mxu1 %v516_v12  ;;  %904 = vmatprep.subr.mxu0 %v518_v13 }
 0x139   : > { %834 = vmatpush2.msra.mxu1 %v515_v14  ;;  %905 = vmatpush2.msra.mxu0 %v517_v15 }
 0x13a   : > { %835 = vmatprep.subr.mxu1 %v508_v16  ;;  %906 = vmatprep.subr.mxu0 %v510_v17 }
 0x13b   : > { %836 = vmatpush2.msra.mxu1 %v507_v18  ;;  %907 = vmatpush2.msra.mxu0 %v509_v19 }
 0x13c   : > { %838 = vmatmul.mubr.f32.vlgmr.msra.gmra.mxu1 %v1354_v22  ;;  %909 = vmatmul.mubr.f32.vlgmr.msra.gmra.mxu0 %v1354_v22 }
 0x1bb   : > { %v697_v20 = vpop.f32.mrf.mxu1  ;;  %v768_v21 = vpop.f32.mrf.mxu0 }
 0x1bc   : > { %915 = vst [vmem:[%s257_s14] sm:$0xff] %v697_v20  ;;  %917 = vst [vmem:[%s257_s14 + $0x10] sm:$0xff] %v768_v21 }
 0x1bd   : > { %v699_v23 = vpop.f32.mrf.mxu1  ;;  %v770_v24 = vpop.f32.mrf.mxu0 }
 0x1be   : > { %916 = vst [vmem:[%s257_s14 + $0x8] sm:$0xff] %v699_v23  ;;  %918 = vst [vmem:[%s257_s14 + $0x18] sm:$0xff] %v770_v24 }
 0x1fc   : > { %v839_v25 = vpop.f32.mrf.mxu1  ;;  %v910_v26 = vpop.f32.mrf.mxu0 }
 0x1fd   : > { %919 = vst [vmem:[%s257_s14 + $0x20] sm:$0xff] %v839_v25  ;;  %921 = vst [vmem:[%s257_s14 + $0x30] sm:$0xff] %v910_v26 }
 0x1fe   : > { %v841_v22 = vpop.f32.mrf.mxu1  ;;  %v912_v27 = vpop.f32.mrf.mxu0 }
 0x1ff   : > { %920 = vst [vmem:[%s257_s14 + $0x28] sm:$0xff] %v841_v22  ;;  %922 = vst [vmem:[%s257_s14 + $0x38] sm:$0xff] %v912_v27 }
 0x200   : > { %1159 = shalt.err (!%p1156_p3)
}
 0x201   : > { %s1160_s9 = scalar_lea.hbm %s1365_s25, 1024  ;;  %s1164_s12 = scalar_lea.hbm %s1416_s5, 2048 }
 0x202   : > { %p1161_p5 = scmp.ne.s32.totalorder %s1365_s25, %s1160_s9  ;;  %p1165_p9 = scmp.lt.s32.totalorder %s1365_s25, %s1416_s5 }
 0x203   : > { %p1166_p12 = scmp.lt.s32.totalorder %s1164_s12, %s1160_s9 }
 0x204   : > { %p1162_p6 = pnand %p1161_p5, %p1304_p4 }
 0x205   : > { %p1167_p10 = por %p1166_p12, %p1165_p9 }
 0x206   : > { %p1163_p7 = pneg %p1162_p6 }
 0x208   : > { %p1168_p11 = pnand %p1167_p10, %p1163_p7 }
 0x20a   : > { %1171 = shalt.err (!%p1168_p11)
}
 0x20b   : > { %1052 = dma.vmem_to_hbm [thread:$0]  (%p1304_p4), %s1367_s16, 1024, %s1365_s25, %s924_s21  }
 0x20c PF: > { %p1064_p13 = scmp.ge.s32.totalorder %s1226_s23, 2  ;;  %s952_s15 = sand.u32 1, %s1206_s18  }
 0x20d   : > { %s953_s17 = scalar_lea.sflag [#allocation4], %s952_s15 }
 0x20e   : > { %p1059_p0 = pnand %p1064_p13, %p1311_p8 }
 0x210   : > { %p1060_p1 = pneg %p1059_p0 }
 0x212   : > { %1201 = dma.done.wait (%p1060_p1), %s953_s17, 1024  }
 0x213   : > { %1203 = vsyncadd (%p1060_p1), %s953_s17, 4294966272  ;;  %s19_s23 = sadd.s32 1, %s1226_s23   ;;  %s1421_s18 = smov %s1210_s19 }
 0x214   : > { %p16_p2 = scmp.ge.s32.totalorder %s19_s23, 4   ;;  %s1422_s19 = smov %s1214_s20 }
 0x215   : > { %s1423_s20 = smov %s1317_s6  ;;  %s1424_s21 = smov %s1222_s22 }
 0x216   : > { %s1425_s22 = smov %s1427_s26  ;;  %18 = sbr.rel (!%p16_p2) target bundleno = 5 (0x5), region = 80 }
 0x21b   :  { %958 = vsyncpa [#allocation3], 1 }
 0x21c   :  { %960 = vsyncpa [#allocation3 + $0x1], 1 }
 0x21d   :  { %961 = vsyncpa [#allocation4], 1 }
 0x21e   :  { %963 = vsyncpa [#allocation4 + $0x1], 1 }

</bundles_post_ra>
